<compile_context>
chip_gen: v7x
topology: tpu7x:2x2x1
jax: 0.10.0
libtpu: 0.0.40
codegen_flags: <defaults>
</compile_context>

<pallas_src>
import functools
import math

import jax
import jax.numpy as jnp
import numpy as np
from jax.experimental import pallas as pl
from jax.experimental.pallas import tpu as pltpu


# ----------------------------------------------------------------------------
# Helpers.
# ----------------------------------------------------------------------------
def _images_per_block(N, H, target_rows=128):
    """Images stacked on the matmul M dimension per grid step.

    Targets M = nb*H >= target_rows (amortize MXU pipeline fill and the
    ~0.35us per-step cost), but keeps >= 2 grid steps when N >= 2 so both
    v7x TensorCores get work under dimension_semantics=("parallel",)."""
    nb = max(1, min(N, max(1, target_rows // max(H, 1))))
    if N >= 2:
        nb = max(1, min(nb, N // 2))
    while N % nb:
        nb -= 1
    return nb


def _row_shift(p, shift, rows):
    """q[r] = p[(r - shift) % rows]; wrapped rows are masked by the caller."""
    shift = shift % rows
    if shift == 0:
        return p
    if rows % 8 == 0:
        return pltpu.roll(p, shift=shift, axis=0)      # XLU sublane rotate
    # Fallback (unaligned row count): explicit two-slice concat.
    return jnp.concatenate([p[rows - shift:, :], p[:rows - shift, :]], axis=0)


# ----------------------------------------------------------------------------
# Fused 3x3-conv head kernel: three lane-dense MXU dots + bias + loc-map + exp.
# ----------------------------------------------------------------------------
def _fused_head_kernel(x_ref, w_ref, b_ref, out_ref, *, img_rows, Ct,
                       exp_start, stride, add_location):
    # x_ref   : (R, W*Cin)      bf16, nb images stacked on rows (R = nb*img_rows)
    # w_ref   : (3*W*Cin, W*Ct) bf16, block-Toeplitz conv weights (dx taps encoded)
    # b_ref   : (1, W*Ct)       f32, bias (+ folded x-location shift on channel 0)
    # out_ref : (R, W*Ct)       f32, (w, cout) flattened on lanes -> dense stores
    R, WCin = x_ref.shape
    WCt = out_ref.shape[1]
    x = x_ref[...]

    # One MXU dot per dy tap (K = W*Cin); dx / horizontal padding live in w_ref.
    p_top = jnp.dot(x, w_ref[0:WCin, :], preferred_element_type=jnp.float32)
    p_mid = jnp.dot(x, w_ref[WCin:2 * WCin, :], preferred_element_type=jnp.float32)
    p_bot = jnp.dot(x, w_ref[2 * WCin:3 * WCin, :], preferred_element_type=jnp.float32)

    # Reduced-rank row index / per-image row index.
    row = jax.lax.broadcasted_iota(jnp.int32, (R, 1), 0)
    if img_rows & (img_rows - 1) == 0:
        rim = jnp.bitwise_and(row, img_rows - 1)       # row % img_rows (pow2)
    else:
        rim = row % img_rows
    not_first = rim != 0                               # (R, 1)
    not_last = rim != img_rows - 1                     # (R, 1)

    # Vertical halo by shifted accumulation of the dot outputs: output row r
    # receives p_top[r-1] and p_bot[r+1]; per-image boundary rows (and the
    # roll wrap rows) are masked to zero == SAME zero padding.
    y = p_mid + b_ref[...]
    y = y + jnp.where(not_first, _row_shift(p_top, 1, R), 0.0)
    y = y + jnp.where(not_last, _row_shift(p_bot, -1, R), 0.0)

    # Reduced-rank output-channel index (lane % Ct).
    lane = jax.lax.broadcasted_iota(jnp.int32, (1, WCt), 1)
    if Ct & (Ct - 1) == 0:
        co = jnp.bitwise_and(lane, Ct - 1)
    else:
        co = lane % Ct

    if add_location:
        # y-shift of the location map (x-shift is folded into the bias).
        locy = (rim * stride + (stride // 2)).astype(jnp.float32) * 0.01  # (R,1)
        y = y + jnp.where(co == 1, locy, 0.0)
    if exp_start < Ct:
        # NOTE: exp is evaluated on all lanes then selected (benign, no NaN
        # propagation) -> EUP does 2x work for the proposal head.  A blocked
        # [embed | margin] column order would make the exp slice contiguous but
        # forces an un-interleave transpose on the output; accepted as-is.
        y = jnp.where(co >= exp_start, jnp.exp(y), y)

    out_ref[...] = y.astype(out_ref.dtype)


def _build_conv_toeplitz(wt, W):
    """(3,3,Cin,Cout) HWIO weights -> (3*W*Cin, W*Cout) matmul operand.

    With X[h, s*Cin + ci] = x[h, s, ci], (X @ A[dy*W*Cin:(dy+1)*W*Cin, :]) is
    the contribution of input row h to output row h - (dy - 1); out-of-range
    dx taps are dropped from A (== zero padding along width)."""
    _, _, Cin, Cout = wt.shape
    s_idx = jnp.arange(W)[None, :, None]            # source column s
    w_idx = jnp.arange(W)[None, None, :]            # output column w
    dx_idx = jnp.arange(3)[:, None, None]
    sel = (s_idx == w_idx + dx_idx - 1).astype(wt.dtype)        # (3, W, W) [dx, s, w]
    a5 = jnp.einsum("dsw,ydio->ysiwo", sel, wt)                 # (3, W, Cin, W, Cout)
    return a5.reshape(3 * W * Cin, W * Cout)


def fused_conv3x3_head(x, w_hwio, bias, *, stride, exp_start=None,
                       add_location=True):
    """y = conv3x3_same(x, w) + b ; y[...,0:2] += location_map(stride)/100 ;
       y[..., exp_start:] = exp(y[..., exp_start:]).

    x: (N, H, W, Cin) f32, w_hwio: (3, 3, Cin, Cout), bias: (Cout,).
    Returns (N, H, W, Cout) f32."""
    N, H, W, Cin = x.shape
    Ct = w_hwio.shape[-1]
    if exp_start is None:
        exp_start = Ct                              # no exp anywhere
    WCin, WCt = W * Cin, W * Ct

    # Trace-time operand prep (weight-sized; never touches the feature map in
    # HBM).  MXU operands in bf16, everything else f32.
    a_mat = _build_conv_toeplitz(w_hwio.astype(jnp.float32), W).astype(jnp.bfloat16)
    b2 = jnp.tile(bias.astype(jnp.float32), (W, 1))             # (W, Ct)
    if add_location:
        xs = (jnp.arange(W, dtype=jnp.float32) * stride + (stride // 2)) * 0.01
        b2 = b2.at[:, 0].add(xs)                    # fold x-shift of location map
    b_row = b2.reshape(1, WCt)
    x2 = x.reshape(N * H, WCin).astype(jnp.bfloat16)            # free reshape

    nb = _images_per_block(N, H)                    # images per grid step
    R = nb * H                                      # matmul M per step
    grid = (N // nb,)

    kernel = functools.partial(
        _fused_head_kernel, img_rows=H, Ct=Ct,
        exp_start=exp_start, stride=stride, add_location=add_location)

    out = pl.pallas_call(
        kernel,
        out_shape=jax.ShapeDtypeStruct((N * H, WCt), jnp.float32),
        grid=grid,
        in_specs=[
            pl.BlockSpec((R, WCin), lambda i: (i, 0)),
            # A and b are grid-invariant (index (0,0) every step -> fetched
            # once).  TODO(synk): single-buffer them (pipeline_mode=
            # pl.Buffered(1)) when tiles grow and VMEM gets tight (v7x 64 MiB).
            pl.BlockSpec((3 * WCin, WCt), lambda i: (0, 0)),
            pl.BlockSpec((1, WCt), lambda i: (0, 0)),
        ],
        out_specs=pl.BlockSpec((R, WCt), lambda i: (i, 0)),
        compiler_params=pltpu.CompilerParams(
            dimension_semantics=("parallel",)),
    )(x2, a_mat, b_row)
    return out.reshape(N, H, W, Ct)


# ----------------------------------------------------------------------------
# Module-level glue (parameter setup, trace-time weight folding).
# ----------------------------------------------------------------------------
def make_embed_head_params(key, in_channels, embed_dim):
    k1, k2 = jax.random.split(key)
    w_spatial = 0.01 * jax.random.normal(k1, (3, 3, in_channels, 2), jnp.float32)
    w_free = 0.01 * jax.random.normal(k2, (3, 3, in_channels, embed_dim - 2),
                                      jnp.float32)
    w = jnp.concatenate([w_spatial, w_free], axis=-1)      # (3,3,Cin,embed_dim)
    b = jnp.zeros((embed_dim,), jnp.float32)
    return w, b


def embed_head_forward(x, params, stride, embed_dim):
    """EmbedHead.forward: conv3x3 (+ location_map/100 on channels 0,1)."""
    del embed_dim  # implicit in params; must be >= 2
    w, b = params
    return fused_conv3x3_head(x, w, b, stride=stride, exp_start=None,
                              add_location=True)


def make_proposal_head_params(key, in_channels, embed_dim, init_margin_bias):
    k1, k2, k3 = jax.random.split(key, 3)
    w_sm = 0.01 * jax.random.normal(k1, (3, 3, in_channels, 2), jnp.float32)
    w_fm = 0.01 * jax.random.normal(k2, (3, 3, in_channels, embed_dim - 2),
                                    jnp.float32)
    w_margin = jnp.concatenate([w_sm, w_fm], axis=-1)
    b_margin = jnp.full((embed_dim,), init_margin_bias, jnp.float32)
    margin_scales = jnp.ones((5,), jnp.float32)             # Scale(init=1.0) x 5
    embed_params = make_embed_head_params(k3, in_channels, embed_dim)
    return dict(w_margin=w_margin, b_margin=b_margin,
                margin_scales=margin_scales, embed_params=embed_params)


def proposal_head_forward(x, params, l, *, embed_dim, margin_reduce_factor,
                          fpn_strides):
    """ProposalHead.forward (PROPOSAL_HEAD == 'Conv3'), single fused kernel.

    The margin conv (with Scale(margin_scales[l]) and 1/margin_reduce_factor
    folded into its weights/bias) and the embed conv share one pallas_call and
    write directly into the concatenated output: [embed | margin]."""
    we, be = params["embed_params"]
    s_l = params["margin_scales"][l]
    scale_vec = jnp.concatenate([jnp.full((2,), s_l, jnp.float32),
                                 jnp.ones((embed_dim - 2,), jnp.float32)])
    w_margin_f = params["w_margin"] * (scale_vec / margin_reduce_factor)
    b_margin_f = params["b_margin"] * scale_vec
    w_all = jnp.concatenate([we, w_margin_f], axis=-1)      # (3,3,Cin,2*embed_dim)
    b_all = jnp.concatenate([be, b_margin_f], axis=0)       # (2*embed_dim,)
    return fused_conv3x3_head(x, w_all, b_all, stride=fpn_strides[l],
                              exp_start=embed_dim, add_location=True)


# ----------------------------------------------------------------------------
# Plain-JAX reference (for correctness check of the Pallas kernel).
# ----------------------------------------------------------------------------
def conv3x3_ref(x, w, b):
    y = jax.lax.conv_general_dilated(
        x, w, window_strides=(1, 1), padding="SAME",
        dimension_numbers=("NHWC", "HWIO", "NHWC"))
    return y + b.reshape(1, 1, 1, -1)


def location_map_ref(H, W, stride):
    xs = jnp.arange(W, dtype=jnp.float32) * stride + (stride // 2)
    ys = jnp.arange(H, dtype=jnp.float32) * stride + (stride // 2)
    sx = jnp.broadcast_to(xs[None, :], (H, W))
    sy = jnp.broadcast_to(ys[:, None], (H, W))
    return jnp.stack([sx, sy], axis=-1) / 100.0             # (H, W, 2)


def embed_head_ref(x, params, stride):
    w, b = params
    _, H, W, _ = x.shape
    e = conv3x3_ref(x, w, b)
    return e.at[..., :2].add(location_map_ref(H, W, stride)[None])


def proposal_head_ref(x, params, l, *, embed_dim, margin_reduce_factor,
                      fpn_strides):
    del embed_dim
    margin_x = x / margin_reduce_factor
    m = conv3x3_ref(margin_x, params["w_margin"], params["b_margin"])
    s = params["margin_scales"][l]
    spatial_margin = jnp.exp(m[..., :2] * s)
    free_margin = jnp.exp(m[..., 2:])
    e = embed_head_ref(x, params["embed_params"], fpn_strides[l])
    return jnp.concatenate([e, spatial_margin, free_margin], axis=-1)


# ----------------------------------------------------------------------------
if __name__ == "__main__":
    # Synthetic cfg values (cfg.MODEL.EMBEDMASK.*)
    embed_dim = 8
    prior_margin = 2.0
    init_margin_bias = math.log(-math.log(0.5) / prior_margin ** 2)
    margin_reduce_factor = 8.0
    fpn_strides = [8, 16, 32, 64, 128]
    in_channels = 8                    # proposal_generator.in_channels_to_top_module
    mask_branch_out_channels = 8       # cfg.MODEL.EMBEDMASK.MASK_BRANCH.OUT_CHANNELS
    mask_branch_out_stride = 4

    N, H, W = 2, 16, 16
    key = jax.random.PRNGKey(0)
    kx, km, kp, kh = jax.random.split(key, 4)

    # TODO(synk): backbone / FCOS proposal generator / mask branch / mask_pred /
    # Instances post-processing are external modules; here we feed synthetic
    # feature maps directly into the EmbedMask-owned heads.
    x = jax.random.normal(kx, (N, H, W, in_channels), jnp.float32)           # FPN feat
    mask_feats = jax.random.normal(km, (N, H, W, mask_branch_out_channels),
                                   jnp.float32)                              # mask-branch feat

    proposal_params = make_proposal_head_params(kp, in_channels, embed_dim,
                                                init_margin_bias)
    pixel_head_params = make_embed_head_params(kh, mask_branch_out_channels,
                                               embed_dim)

    level = 0

    # Both head invocations live in one jitted executable (single dispatch for
    # the weight folding + the two pallas custom-calls).
    @jax.jit
    def run_heads(x_in, mask_in):
        pf = proposal_head_forward(
            x_in, proposal_params, level, embed_dim=embed_dim,
            margin_reduce_factor=margin_reduce_factor, fpn_strides=fpn_strides)
        pe = embed_head_forward(mask_in, pixel_head_params,
                                mask_branch_out_stride, embed_dim)
        return pf, pe

    proposal_feat, pixel_embed = run_heads(x, mask_feats)
    proposal_feat = jax.block_until_ready(proposal_feat)
    pixel_embed = jax.block_until_ready(pixel_embed)

    assert proposal_feat.shape == (N, H, W, 2 * embed_dim)
    assert pixel_embed.shape == (N, H, W, embed_dim)

    # Correctness check against plain-JAX f32 reference.  Tolerance is 1e-2
    # because the MXU operands (x, Toeplitz weights) are bf16; accumulation,
    # bias, location and exp are f32.
    ref_prop = proposal_head_ref(
        x, proposal_params, level, embed_dim=embed_dim,
        margin_reduce_factor=margin_reduce_factor, fpn_strides=fpn_strides)
    ref_pix = embed_head_ref(mask_feats, pixel_head_params,
                             mask_branch_out_stride)
    np.testing.assert_allclose(np.asarray(proposal_feat), np.asarray(ref_prop),
                               rtol=1e-2, atol=1e-2)
    np.testing.assert_allclose(np.asarray(pixel_embed), np.asarray(ref_pix),
                               rtol=1e-2, atol=1e-2)

    print("KERNEL_OK")
</pallas_src>

<mosaic_0001>
module attributes {stable_mosaic.version = 11 : i64} {
  func.func @_fused_head_kernel(%arg0: i32, %arg1: memref<16x128xbf16, #tpu.memory_space<vmem>>, %arg2: memref<384x256xbf16, #tpu.memory_space<vmem>>, %arg3: memref<1x256xf32, #tpu.memory_space<vmem>>, %arg4: memref<16x256xf32, #tpu.memory_space<vmem>>) attributes {dimension_semantics = [#tpu.dimension_semantics<parallel>], iteration_bounds = array<i64: 2>, scalar_prefetch = 0 : i64, scratch_operands = 0 : i64, tpu.core_type = #tpu.core_type<tc>, window_params = [{transform_indices = @transform_0, window_bounds = array<i64: 16, 128>}, {pipeline_mode = #tpu.pipeline_mode<synchronous>, transform_indices = @transform_1, window_bounds = array<i64: 384, 256>}, {pipeline_mode = #tpu.pipeline_mode<synchronous>, transform_indices = @transform_2, window_bounds = array<i64: 1, 256>}, {transform_indices = @transform_3, window_bounds = array<i64: 16, 256>}]} {
    %c0 = arith.constant 0 : index
    %c0_0 = arith.constant 0 : index
    %0 = vector.load %arg1[%c0, %c0_0] : memref<16x128xbf16, #tpu.memory_space<vmem>>, vector<16x128xbf16>
    %c0_1 = arith.constant 0 : index
    %c0_2 = arith.constant 0 : index
    %1 = vector.load %arg2[%c0_1, %c0_2] : memref<384x256xbf16, #tpu.memory_space<vmem>>, vector<128x256xbf16>
    %cst = arith.constant dense<0.000000e+00> : vector<16x256xf32>
    %2 = tpu.matmul %0, %1, %cst {dimension_numbers = #tpu.dot_dimension_numbers<[1], [0], [0], [1], [0, 0, 1, 1], [], []>} : vector<16x128xbf16>, vector<128x256xbf16>, vector<16x256xf32> -> vector<16x256xf32>
    %c128 = arith.constant 128 : index
    %c0_3 = arith.constant 0 : index
    %3 = vector.load %arg2[%c128, %c0_3] : memref<384x256xbf16, #tpu.memory_space<vmem>>, vector<128x256xbf16>
    %cst_4 = arith.constant dense<0.000000e+00> : vector<16x256xf32>
    %4 = tpu.matmul %0, %3, %cst_4 {dimension_numbers = #tpu.dot_dimension_numbers<[1], [0], [0], [1], [0, 0, 1, 1], [], []>} : vector<16x128xbf16>, vector<128x256xbf16>, vector<16x256xf32> -> vector<16x256xf32>
    %c256 = arith.constant 256 : index
    %c0_5 = arith.constant 0 : index
    %5 = vector.load %arg2[%c256, %c0_5] : memref<384x256xbf16, #tpu.memory_space<vmem>>, vector<128x256xbf16>
    %cst_6 = arith.constant dense<0.000000e+00> : vector<16x256xf32>
    %6 = tpu.matmul %0, %5, %cst_6 {dimension_numbers = #tpu.dot_dimension_numbers<[1], [0], [0], [1], [0, 0, 1, 1], [], []>} : vector<16x128xbf16>, vector<128x256xbf16>, vector<16x256xf32> -> vector<16x256xf32>
    %7 = tpu.iota {dimensions = array<i32: 0>} : vector<16x1xi32>
    %c15_i32 = arith.constant 15 : i32
    %8 = vector.broadcast %c15_i32 : i32 to vector<16x1xi32>
    %9 = arith.andi %7, %8 : vector<16x1xi32>
    %c0_i32 = arith.constant 0 : i32
    %10 = vector.broadcast %c0_i32 : i32 to vector<16x1xi32>
    %11 = arith.cmpi ne, %9, %10 : vector<16x1xi32>
    %c15_i32_7 = arith.constant 15 : i32
    %12 = vector.broadcast %c15_i32_7 : i32 to vector<16x1xi32>
    %13 = arith.cmpi ne, %9, %12 : vector<16x1xi32>
    %c0_8 = arith.constant 0 : index
    %c0_9 = arith.constant 0 : index
    %14 = vector.load %arg3[%c0_8, %c0_9] : memref<1x256xf32, #tpu.memory_space<vmem>>, vector<1x256xf32>
    %15 = vector.broadcast %14 : vector<1x256xf32> to vector<16x256xf32>
    %16 = arith.addf %4, %15 : vector<16x256xf32>
    %c1_i32 = arith.constant 1 : i32
    %17 = tpu.dynamic_rotate %2 by %c1_i32 dim 0 : vector<16x256xf32>, i32 -> vector<16x256xf32>
    %cst_10 = arith.constant 0.000000e+00 : f32
    %18 = vector.shape_cast %11 : vector<16x1xi1> to vector<16x1xi1>
    %19 = vector.broadcast %18 : vector<16x1xi1> to vector<16x256xi1>
    %20 = vector.broadcast %cst_10 : f32 to vector<16x256xf32>
    %21 = arith.select %19, %17, %20 : vector<16x256xi1>, vector<16x256xf32>
    %22 = arith.addf %16, %21 : vector<16x256xf32>
    %c15_i32_11 = arith.constant 15 : i32
    %23 = tpu.dynamic_rotate %6 by %c15_i32_11 dim 0 : vector<16x256xf32>, i32 -> vector<16x256xf32>
    %cst_12 = arith.constant 0.000000e+00 : f32
    %24 = vector.shape_cast %13 : vector<16x1xi1> to vector<16x1xi1>
    %25 = vector.broadcast %24 : vector<16x1xi1> to vector<16x256xi1>
    %26 = vector.broadcast %cst_12 : f32 to vector<16x256xf32>
    %27 = arith.select %25, %23, %26 : vector<16x256xi1>, vector<16x256xf32>
    %28 = arith.addf %22, %27 : vector<16x256xf32>
    %29 = tpu.iota {dimensions = array<i32: 1>} : vector<1x256xi32>
    %c15_i32_13 = arith.constant 15 : i32
    %30 = vector.broadcast %c15_i32_13 : i32 to vector<1x256xi32>
    %31 = arith.andi %29, %30 : vector<1x256xi32>
    %c8_i32 = arith.constant 8 : i32
    %32 = vector.broadcast %c8_i32 : i32 to vector<16x1xi32>
    %33 = arith.muli %9, %32 : vector<16x1xi32>
    %c4_i32 = arith.constant 4 : i32
    %34 = vector.broadcast %c4_i32 : i32 to vector<16x1xi32>
    %35 = arith.addi %33, %34 : vector<16x1xi32>
    %36 = arith.sitofp %35 : vector<16x1xi32> to vector<16x1xf32>
    %cst_14 = arith.constant 0.00999999977 : f32
    %37 = vector.broadcast %cst_14 : f32 to vector<16x1xf32>
    %38 = arith.mulf %36, %37 : vector<16x1xf32>
    %c1_i32_15 = arith.constant 1 : i32
    %39 = vector.broadcast %c1_i32_15 : i32 to vector<1x256xi32>
    %40 = arith.cmpi eq, %31, %39 : vector<1x256xi32>
    %cst_16 = arith.constant 0.000000e+00 : f32
    %41 = vector.shape_cast %40 : vector<1x256xi1> to vector<1x256xi1>
    %42 = vector.broadcast %41 : vector<1x256xi1> to vector<16x256xi1>
    %43 = vector.shape_cast %38 : vector<16x1xf32> to vector<16x1xf32>
    %44 = vector.broadcast %43 : vector<16x1xf32> to vector<16x256xf32>
    %45 = vector.broadcast %cst_16 : f32 to vector<16x256xf32>
    %46 = arith.select %42, %44, %45 : vector<16x256xi1>, vector<16x256xf32>
    %47 = arith.addf %28, %46 : vector<16x256xf32>
    %c8_i32_17 = arith.constant 8 : i32
    %48 = vector.broadcast %c8_i32_17 : i32 to vector<1x256xi32>
    %49 = arith.cmpi sge, %31, %48 : vector<1x256xi32>
    %50 = math.exp %47 : vector<16x256xf32>
    %51 = vector.shape_cast %49 : vector<1x256xi1> to vector<1x256xi1>
    %52 = vector.broadcast %51 : vector<1x256xi1> to vector<16x256xi1>
    %53 = arith.select %52, %50, %47 : vector<16x256xi1>, vector<16x256xf32>
    %c0_18 = arith.constant 0 : index
    %c0_19 = arith.constant 0 : index
    %54 = vector.load %arg4[%c0_18, %c0_19] : memref<16x256xf32, #tpu.memory_space<vmem>>, vector<16x256xf32>
    tpu.vector_store %arg4[%c0_18, %c0_19], %53 {strides = array<i32>} : memref<16x256xf32, #tpu.memory_space<vmem>>, vector<16x256xf32>,
    return
  }
  func.func @transform_0(%arg0: i32) -> (i32, i32) {
    %c0_i32 = arith.constant 0 : i32
    %c0_i32_0 = arith.constant 0 : i32
    return %arg0, %c0_i32 : i32, i32
  }
  func.func @transform_1(%arg0: i32) -> (i32, i32) {
    %c0_i32 = arith.constant 0 : i32
    %c0_i32_0 = arith.constant 0 : i32
    %c0_i32_1 = arith.constant 0 : i32
    return %c0_i32, %c0_i32_0 : i32, i32
  }
  func.func @transform_2(%arg0: i32) -> (i32, i32) {
    %c0_i32 = arith.constant 0 : i32
    %c0_i32_0 = arith.constant 0 : i32
    %c0_i32_1 = arith.constant 0 : i32
    return %c0_i32, %c0_i32_0 : i32, i32
  }
  func.func @transform_3(%arg0: i32) -> (i32, i32) {
    %c0_i32 = arith.constant 0 : i32
    %c0_i32_0 = arith.constant 0 : i32
    return %arg0, %c0_i32 : i32, i32
  }
}

module attributes {stable_mosaic.version = 11 : i64} {
  func.func @_fused_head_kernel(%arg0: i32, %arg1: memref<16x128xbf16, #tpu.memory_space<vmem>>, %arg2: memref<384x128xbf16, #tpu.memory_space<vmem>>, %arg3: memref<1x128xf32, #tpu.memory_space<vmem>>, %arg4: memref<16x128xf32, #tpu.memory_space<vmem>>) attributes {dimension_semantics = [#tpu.dimension_semantics<parallel>], iteration_bounds = array<i64: 2>, scalar_prefetch = 0 : i64, scratch_operands = 0 : i64, tpu.core_type = #tpu.core_type<tc>, window_params = [{transform_indices = @transform_0, window_bounds = array<i64: 16, 128>}, {pipeline_mode = #tpu.pipeline_mode<synchronous>, transform_indices = @transform_1, window_bounds = array<i64: 384, 128>}, {pipeline_mode = #tpu.pipeline_mode<synchronous>, transform_indices = @transform_2, window_bounds = array<i64: 1, 128>}, {transform_indices = @transform_3, window_bounds = array<i64: 16, 128>}]} {
    %c0 = arith.constant 0 : index
    %c0_0 = arith.constant 0 : index
    %0 = vector.load %arg1[%c0, %c0_0] : memref<16x128xbf16, #tpu.memory_space<vmem>>, vector<16x128xbf16>
    %c0_1 = arith.constant 0 : index
    %c0_2 = arith.constant 0 : index
    %1 = vector.load %arg2[%c0_1, %c0_2] : memref<384x128xbf16, #tpu.memory_space<vmem>>, vector<128x128xbf16>
    %cst = arith.constant dense<0.000000e+00> : vector<16x128xf32>
    %2 = tpu.matmul %0, %1, %cst {dimension_numbers = #tpu.dot_dimension_numbers<[1], [0], [0], [1], [0, 0, 1, 1], [], []>} : vector<16x128xbf16>, vector<128x128xbf16>, vector<16x128xf32> -> vector<16x128xf32>
    %c128 = arith.constant 128 : index
    %c0_3 = arith.constant 0 : index
    %3 = vector.load %arg2[%c128, %c0_3] : memref<384x128xbf16, #tpu.memory_space<vmem>>, vector<128x128xbf16>
    %cst_4 = arith.constant dense<0.000000e+00> : vector<16x128xf32>
    %4 = tpu.matmul %0, %3, %cst_4 {dimension_numbers = #tpu.dot_dimension_numbers<[1], [0], [0], [1], [0, 0, 1, 1], [], []>} : vector<16x128xbf16>, vector<128x128xbf16>, vector<16x128xf32> -> vector<16x128xf32>
    %c256 = arith.constant 256 : index
    %c0_5 = arith.constant 0 : index
    %5 = vector.load %arg2[%c256, %c0_5] : memref<384x128xbf16, #tpu.memory_space<vmem>>, vector<128x128xbf16>
    %cst_6 = arith.constant dense<0.000000e+00> : vector<16x128xf32>
    %6 = tpu.matmul %0, %5, %cst_6 {dimension_numbers = #tpu.dot_dimension_numbers<[1], [0], [0], [1], [0, 0, 1, 1], [], []>} : vector<16x128xbf16>, vector<128x128xbf16>, vector<16x128xf32> -> vector<16x128xf32>
    %7 = tpu.iota {dimensions = array<i32: 0>} : vector<16x1xi32>
    %c15_i32 = arith.constant 15 : i32
    %8 = vector.broadcast %c15_i32 : i32 to vector<16x1xi32>
    %9 = arith.andi %7, %8 : vector<16x1xi32>
    %c0_i32 = arith.constant 0 : i32
    %10 = vector.broadcast %c0_i32 : i32 to vector<16x1xi32>
    %11 = arith.cmpi ne, %9, %10 : vector<16x1xi32>
    %c15_i32_7 = arith.constant 15 : i32
    %12 = vector.broadcast %c15_i32_7 : i32 to vector<16x1xi32>
    %13 = arith.cmpi ne, %9, %12 : vector<16x1xi32>
    %c0_8 = arith.constant 0 : index
    %c0_9 = arith.constant 0 : index
    %14 = vector.load %arg3[%c0_8, %c0_9] : memref<1x128xf32, #tpu.memory_space<vmem>>, vector<1x128xf32>
    %15 = vector.broadcast %14 : vector<1x128xf32> to vector<16x128xf32>
    %16 = arith.addf %4, %15 : vector<16x128xf32>
    %c1_i32 = arith.constant 1 : i32
    %17 = tpu.dynamic_rotate %2 by %c1_i32 dim 0 : vector<16x128xf32>, i32 -> vector<16x128xf32>
    %cst_10 = arith.constant 0.000000e+00 : f32
    %18 = vector.shape_cast %11 : vector<16x1xi1> to vector<16x1xi1>
    %19 = vector.broadcast %18 : vector<16x1xi1> to vector<16x128xi1>
    %20 = vector.broadcast %cst_10 : f32 to vector<16x128xf32>
    %21 = arith.select %19, %17, %20 : vector<16x128xi1>, vector<16x128xf32>
    %22 = arith.addf %16, %21 : vector<16x128xf32>
    %c15_i32_11 = arith.constant 15 : i32
    %23 = tpu.dynamic_rotate %6 by %c15_i32_11 dim 0 : vector<16x128xf32>, i32 -> vector<16x128xf32>
    %cst_12 = arith.constant 0.000000e+00 : f32
    %24 = vector.shape_cast %13 : vector<16x1xi1> to vector<16x1xi1>
    %25 = vector.broadcast %24 : vector<16x1xi1> to vector<16x128xi1>
    %26 = vector.broadcast %cst_12 : f32 to vector<16x128xf32>
    %27 = arith.select %25, %23, %26 : vector<16x128xi1>, vector<16x128xf32>
    %28 = arith.addf %22, %27 : vector<16x128xf32>
    %29 = tpu.iota {dimensions = array<i32: 1>} : vector<1x128xi32>
    %c7_i32 = arith.constant 7 : i32
    %30 = vector.broadcast %c7_i32 : i32 to vector<1x128xi32>
    %31 = arith.andi %29, %30 : vector<1x128xi32>
    %c4_i32 = arith.constant 4 : i32
    %32 = vector.broadcast %c4_i32 : i32 to vector<16x1xi32>
    %33 = arith.muli %9, %32 : vector<16x1xi32>
    %c2_i32 = arith.constant 2 : i32
    %34 = vector.broadcast %c2_i32 : i32 to vector<16x1xi32>
    %35 = arith.addi %33, %34 : vector<16x1xi32>
    %36 = arith.sitofp %35 : vector<16x1xi32> to vector<16x1xf32>
    %cst_13 = arith.constant 0.00999999977 : f32
    %37 = vector.broadcast %cst_13 : f32 to vector<16x1xf32>
    %38 = arith.mulf %36, %37 : vector<16x1xf32>
    %c1_i32_14 = arith.constant 1 : i32
    %39 = vector.broadcast %c1_i32_14 : i32 to vector<1x128xi32>
    %40 = arith.cmpi eq, %31, %39 : vector<1x128xi32>
    %cst_15 = arith.constant 0.000000e+00 : f32
    %41 = vector.shape_cast %40 : vector<1x128xi1> to vector<1x128xi1>
    %42 = vector.broadcast %41 : vector<1x128xi1> to vector<16x128xi1>
    %43 = vector.shape_cast %38 : vector<16x1xf32> to vector<16x1xf32>
    %44 = vector.broadcast %43 : vector<16x1xf32> to vector<16x128xf32>
    %45 = vector.broadcast %cst_15 : f32 to vector<16x128xf32>
    %46 = arith.select %42, %44, %45 : vector<16x128xi1>, vector<16x128xf32>
    %47 = arith.addf %28, %46 : vector<16x128xf32>
    %c0_16 = arith.constant 0 : index
    %c0_17 = arith.constant 0 : index
    %48 = vector.load %arg4[%c0_16, %c0_17] : memref<16x128xf32, #tpu.memory_space<vmem>>, vector<16x128xf32>
    tpu.vector_store %arg4[%c0_16, %c0_17], %47 {strides = array<i32>} : memref<16x128xf32, #tpu.memory_space<vmem>>, vector<16x128xf32>,
    return
  }
  func.func @transform_0(%arg0: i32) -> (i32, i32) {
    %c0_i32 = arith.constant 0 : i32
    %c0_i32_0 = arith.constant 0 : i32
    return %arg0, %c0_i32 : i32, i32
  }
  func.func @transform_1(%arg0: i32) -> (i32, i32) {
    %c0_i32 = arith.constant 0 : i32
    %c0_i32_0 = arith.constant 0 : i32
    %c0_i32_1 = arith.constant 0 : i32
    return %c0_i32, %c0_i32_0 : i32, i32
  }
  func.func @transform_2(%arg0: i32) -> (i32, i32) {
    %c0_i32 = arith.constant 0 : i32
    %c0_i32_0 = arith.constant 0 : i32
    %c0_i32_1 = arith.constant 0 : i32
    return %c0_i32, %c0_i32_0 : i32, i32
  }
  func.func @transform_3(%arg0: i32) -> (i32, i32) {
    %c0_i32 = arith.constant 0 : i32
    %c0_i32_0 = arith.constant 0 : i32
    return %arg0, %c0_i32 : i32, i32
  }
}

</mosaic_0001>

<bundles_post_ra>
// kernel: run_heads.2
= control target key start
LH: loop header
LB: loop body
LE: loop exit
PB: predicated region body
PF: predicated region fallthrough
CT: control target
= control target key end

     0   :  { %s953_s12 = smov 0   ;;  %s1159_s0 = inlined_call_operand.vmem [shape: bf16[32,128], index: 0, kind: input, shape index: {}]   ;;  %s1160_s1 = inlined_call_operand.vmem [shape: bf16[384,256], index: 1, kind: input, shape index: {}]   ;;  %s1161_s2 = inlined_call_operand.vmem [shape: f32[1,256], index: 2, kind: input, shape index: {}]   ;;  %s1162_s3 = inlined_call_operand.vmem [shape: f32[32,256], index: 3, kind: output, shape index: {}]  }
   0x1 LB: > { %s772_s13 = sadd.s32 4294967295, %s930_s12   ;;  %p776_p0 = scmp.ge.s32.totalorder %s930_s12, 1  ;;  %s930_s12 = sphi %s953_s12, %s13_s12  }
   0x2   : > { %p138_p1 = scmp.lt.s32.totalorder %s930_s12, 3 }
   0x4   : > { %p139_p2 = pnand %p776_p0, %p138_p1 }
   0x5   : > { %v843_v0 = vld [vmem:[%s1160_s1 + $0x4] ss:$8 sps:$4 sm:$0xff] (!%p139_p2)   ;;  %s777_s16 = sshll.u32 (!%p139_p2), %s772_s13, 1  ;;  %v845_v1 = vld [vmem:[%s1160_s1] ss:$8 sps:$4 sm:$0xff] (!%p139_p2)   ;;  %v932_v2 = vmov (!%p139_p2), 0   ;;  %v479_v50 = vlaneseq (!%p139_p2) }
   0x6   : > { %142 = sbr.rel (%p139_p2) target bundleno = 309 (0x135), region = 32  ;;  %313 = vmatprep.mubr.bf16.mxu0 (!%p139_p2), %v932_v2  ;;  %p164_p3 = scmp.lt.s32.totalorder (!%p139_p2), %s777_s16, 3  ;;  %468 = vmatprep.mubr.bf16.mxu1 (!%p139_p2), %v932_v2  ;;  %v846_v3 = vld [vmem:[%s1160_s1 + $0x14] ss:$8 sps:$4 sm:$0xff] (!%p139_p2)   ;;  %v848_v4 = vld [vmem:[%s1160_s1 + $0x10] ss:$8 sps:$4 sm:$0xff] (!%p139_p2)  }
   0x7   : > { %281 = vmatprep.subr.bf16.mxu0 (!%p139_p2), %v843_v0  ;;  %v849_v5 = vld [vmem:[%s1160_s1 + $0x24] ss:$8 sps:$4 sm:$0xff] (!%p139_p2)   ;;  %v851_v6 = vld [vmem:[%s1160_s1 + $0x20] ss:$8 sps:$4 sm:$0xff] (!%p139_p2)   ;;  %v852_v7 = vld [vmem:[%s1160_s1 + $0x34] ss:$8 sps:$4 sm:$0xff] (!%p139_p2)  }
   0x8   : > { %282 = vmatpush1.bf16.msra.mxu0 (!%p139_p2), %v845_v1  ;;  %v854_v8 = vld [vmem:[%s1160_s1 + $0x30] ss:$8 sps:$4 sm:$0xff] (!%p139_p2)   ;;  %v867_v9 = vld [vmem:[%s1160_s1 + $0x104] ss:$8 sps:$4 sm:$0xff] (!%p139_p2)   ;;  %v869_v10 = vld [vmem:[%s1160_s1 + $0x100] ss:$8 sps:$4 sm:$0xff] (!%p139_p2)  }
   0x9   : > { %283 = vmatprep.subr.bf16.mxu0 (!%p139_p2), %v846_v3  ;;  %v855_v11 = vld [vmem:[%s1160_s1 + $0x44] ss:$8 sps:$4 sm:$0xff] (!%p139_p2)   ;;  %436 = vmatprep.subr.bf16.mxu1 (!%p139_p2), %v867_v9  ;;  %v857_v12 = vld [vmem:[%s1160_s1 + $0x40] ss:$8 sps:$4 sm:$0xff] (!%p139_p2)   ;;  %v874_v13 = vld [vmem:[%s1160_s1 + $0x114] ss:$8 sps:$4 sm:$0xff] (!%p139_p2)  }
   0xa   : > { %437 = vmatpush1.bf16.msra.mxu1 (!%p139_p2), %v869_v10  ;;  %v876_v14 = vld [vmem:[%s1160_s1 + $0x110] ss:$8 sps:$4 sm:$0xff] (!%p139_p2)   ;;  %v858_v15 = vld [vmem:[%s1160_s1 + $0x54] ss:$8 sps:$4 sm:$0xff] (!%p139_p2)   ;;  %v880_v16 = vld [vmem:[%s1160_s1 + $0x124] ss:$8 sps:$4 sm:$0xff] (!%p139_p2)  }
   0xb   : > { %438 = vmatprep.subr.bf16.mxu1 (!%p139_p2), %v874_v13  ;;  %v882_v17 = vld [vmem:[%s1160_s1 + $0x120] ss:$8 sps:$4 sm:$0xff] (!%p139_p2)   ;;  %v860_v18 = vld [vmem:[%s1160_s1 + $0x50] ss:$8 sps:$4 sm:$0xff] (!%p139_p2)   ;;  %v861_v19 = vld [vmem:[%s1160_s1 + $0x64] ss:$8 sps:$4 sm:$0xff] (!%p139_p2)  }
   0xc   : > { %284 = vmatpush1.bf16.msra.mxu0 (!%p139_p2), %v848_v4  ;;  %v886_v20 = vld [vmem:[%s1160_s1 + $0x134] ss:$8 sps:$4 sm:$0xff] (!%p139_p2)   ;;  %v888_v21 = vld [vmem:[%s1160_s1 + $0x130] ss:$8 sps:$4 sm:$0xff] (!%p139_p2)   ;;  %v863_v22 = vld [vmem:[%s1160_s1 + $0x60] ss:$8 sps:$4 sm:$0xff] (!%p139_p2)  }
   0xd   : > { %s1172_s16 = smov (!%p164_p3, %s777_s16), 3  ;;  %285 = vmatprep.subr.bf16.mxu0 %v849_v5  ;;  %v892_v23 = vld [vmem:[%s1160_s1 + $0x144] ss:$8 sps:$4 sm:$0xff]   ;;  %v864_v24 = vld [vmem:[%s1160_s1 + $0x74] ss:$8 sps:$4 sm:$0xff]   ;;  %v480_v51 = vshrl.u32 %v479_v50, 7 }
   0xe   : > { %s778_s29 = sshll.u32 %s1172_s16, 2  ;;  %439 = vmatpush1.bf16.msra.mxu1 %v876_v14  ;;  %v894_v25 = vld [vmem:[%s1160_s1 + $0x140] ss:$8 sps:$4 sm:$0xff]   ;;  %v866_v26 = vld [vmem:[%s1160_s1 + $0x70] ss:$8 sps:$4 sm:$0xff]   ;;  %s833_s18 = sshll.u32 %s1172_s16, 4 }
   0xf   : > { %s999_s11 = scalar_lea.vmem %s1159_s0, %s778_s29  ;;  %440 = vmatprep.subr.bf16.mxu1 %v880_v16  ;;  %v898_v27 = vld [vmem:[%s1160_s1 + $0x154] ss:$8 sps:$4 sm:$0xff]   ;;  %v873_v28 = vld [vmem:[%s1160_s1 + $0x84] ss:$8 sps:$4 sm:$0xff]   ;;  %v900_v30 = vld [vmem:[%s1160_s1 + $0x150] ss:$8 sps:$4 sm:$0xff]   ;;  %s174_s21 = scalar_lea.vmem %s1162_s3, %s833_s18 }
  0x10   : > { %286 = vmatpush1.bf16.msra.mxu0 %v851_v6  ;;  %v870_v29 = vld [vmem:[%s999_s11] sm:$0xff]   ;;  %v879_v33 = vld [vmem:[%s1160_s1 + $0x94] ss:$8 sps:$4 sm:$0xff]   ;;  %v877_v35 = vld [vmem:[%s1160_s1 + $0x90] ss:$8 sps:$4 sm:$0xff]   ;;  %vm627_vm0 = vcmp.lt.s32.totalorder %v480_v51, 1 }
  0x11   : > { %287 = vmatprep.subr.bf16.mxu0 %v852_v7  ;;  %v871_v31 = vld [vmem:[%s1160_s1 + $0x80] ss:$8 sps:$4 sm:$0xff]   ;;  %v904_v32 = vld [vmem:[%s1160_s1 + $0x164] ss:$8 sps:$4 sm:$0xff]   ;;  %v910_v36 = vld [vmem:[%s1160_s1 + $0x174] ss:$8 sps:$4 sm:$0xff]  }
  0x12   : > { %441 = vmatpush1.bf16.msra.mxu1 %v882_v17  ;;  %v906_v34 = vld [vmem:[%s1160_s1 + $0x160] ss:$8 sps:$4 sm:$0xff]   ;;  %v885_v37 = vld [vmem:[%s1160_s1 + $0xa4] ss:$8 sps:$4 sm:$0xff]   ;;  %v912_v38 = vld [vmem:[%s1160_s1 + $0x170] ss:$8 sps:$4 sm:$0xff]  }
  0x13   : > { %442 = vmatprep.subr.bf16.mxu1 %v886_v20  ;;  %v883_v39 = vld [vmem:[%s1160_s1 + $0xa0] ss:$8 sps:$4 sm:$0xff]   ;;  %v891_v40 = vld [vmem:[%s1160_s1 + $0xb4] ss:$8 sps:$4 sm:$0xff]   ;;  %v889_v41 = vld [vmem:[%s1160_s1 + $0xb0] ss:$8 sps:$4 sm:$0xff]  }
  0x14   : > { %288 = vmatpush1.bf16.msra.mxu0 %v854_v8  ;;  %v897_v42 = vld [vmem:[%s1160_s1 + $0xc4] ss:$8 sps:$4 sm:$0xff]   ;;  %v895_v43 = vld [vmem:[%s1160_s1 + $0xc0] ss:$8 sps:$4 sm:$0xff]   ;;  %v903_v44 = vld [vmem:[%s1160_s1 + $0xd4] ss:$8 sps:$4 sm:$0xff]  }
  0x15   : > { %289 = vmatprep.subr.bf16.mxu0 %v855_v11  ;;  %v901_v45 = vld [vmem:[%s1160_s1 + $0xd0] ss:$8 sps:$4 sm:$0xff]   ;;  %v909_v46 = vld [vmem:[%s1160_s1 + $0xe4] ss:$8 sps:$4 sm:$0xff]   ;;  %v907_v47 = vld [vmem:[%s1160_s1 + $0xe0] ss:$8 sps:$4 sm:$0xff]  }
  0x16   : > { %443 = vmatpush1.bf16.msra.mxu1 %v888_v21  ;;  %v915_v48 = vld [vmem:[%s1160_s1 + $0xf4] ss:$8 sps:$4 sm:$0xff]   ;;  %v913_v49 = vld [vmem:[%s1160_s1 + $0xf0] ss:$8 sps:$4 sm:$0xff]   ;;  %vm648_vm1 = vcmp.lt.s32.totalorder %v480_v51, 7  ;;  %v481_v7 = vadd.s32 8, %v480_v51 }
  0x17   : > { %444 = vmatprep.subr.bf16.mxu1 %v892_v23  ;;  %v482_v14 = vand.u32 15, %v480_v51  ;;  %v666_v17 = vand.u32 127, %v479_v50  ;;  %v488_v20 = vld [vmem:[%s1161_s2] sm:$0x3]  ;;  %v496_v21 = vsub.s32 1, %v480_v51 }
  0x18   : > { %290 = vmatpush1.bf16.msra.mxu0 %v857_v12  ;;  %v483_v13 = vand.u32 15, %v481_v7 }
  0x19   : > { %291 = vmatprep.subr.bf16.mxu0 %v858_v15  ;;  %v670_v15 = vmul.u32 8, %v482_v14  ;;  %vm1120_vm2 = vcmp.ne.s32.totalorder %v482_v14, 0 }
  0x1a   : > { %445 = vmatpush1.bf16.msra.mxu1 %v894_v25  ;;  %v671_v16 = vmul.u32 8, %v483_v13  ;;  %vm1134_vm5 = vcmp.ne.s32.totalorder %v483_v13, 15 }
  0x1b   : > { %446 = vmatprep.subr.bf16.mxu1 %v898_v27  ;;  %v497_v27 = vrot.slane %v488_v20, %v496_v21 }
  0x1c   : > { %292 = vmatpush1.bf16.msra.mxu0 %v860_v18  ;;  %v672_v18 = vadd.s32 4, %v670_v15  ;;  %v673_v23 = vadd.s32 4, %v671_v16 }
  0x1d   : > { %293 = vmatprep.subr.bf16.mxu0 %v861_v19  ;;  %v492_v19 = vsub.s32 0, %v480_v51 }
  0x1e   : > { %447 = vmatpush1.bf16.msra.mxu1 %v900_v30 }
  0x1f   : > { %448 = vmatprep.subr.bf16.mxu1 %v904_v32  ;;  %v493_v25 = vrot.slane %v488_v20, %v492_v19 }
  0x20   : > { %294 = vmatpush1.bf16.msra.mxu0 %v863_v22  ;;  %v667_v22 = vadd.s32 128, %v666_v17 }
  0x21   : > { %295 = vmatprep.subr.bf16.mxu0 %v864_v24  ;;  %v674_v24 = vcvt.s32.f32 %v672_v18 }
  0x22   : > { %449 = vmatpush1.bf16.msra.mxu1 %v906_v34 }
  0x23   : > { %450 = vmatprep.subr.bf16.mxu1 %v910_v36  ;;  %v676_v32 = vmul.f32 0.01, %v674_v24 }
  0x24   : > { %296 = vmatpush1.bf16.msra.mxu0 %v866_v26  ;;  %v668_v26 = vand.u32 15, %v666_v17 }
  0x25   : > { %580 = vmatprep.subr.bf16.mxu0 %v873_v28  ;;  %v669_v28 = vand.u32 15, %v667_v22 }
  0x26   : > { %451 = vmatpush1.bf16.msra.mxu1 %v912_v38  ;;  %vm1124_vm3 = vcmp.eq.s32.totalorder %v668_v26, 1  ;;  %vm692_vm6 = vcmp.ge.s32.totalorder %v668_v26, 8 }
  0x27   : > { %314 = vmatmul.mubr.bf16.vlgmr.msra.gmra.mrb[0].mxu0 %v870_v29  ;;  %vm1130_vm4 = vcmp.eq.s32.totalorder %v669_v28, 1  ;;  %vm693_vm7 = vcmp.ge.s32.totalorder %v669_v28, 8 }
  0x28   : > { %581 = vmatpush1.bf16.msra.mxu0 %v871_v31  ;;  %612 = vmatprep.mubr.bf16.mxu0 %v932_v2  ;;  %v685_v50 = vsel %vm1130_vm4, %v676_v32, 0.0 }
  0x29   : > { %582 = vmatprep.subr.bf16.mxu0 %v879_v33  ;;  %469 = vmatmul.mubr.bf16.vlgmr.msra.gmra.mrb[0].mxu1 %v870_v29 }
  0x2c   : > { %583 = vmatpush1.bf16.msra.mxu0 %v877_v35 }
  0x2d   : > { %584 = vmatprep.subr.bf16.mxu0 %v885_v37 }
  0x30   : > { %585 = vmatpush1.bf16.msra.mxu0 %v883_v39 }
  0x31   : > { %586 = vmatprep.subr.bf16.mxu0 %v891_v40 }
  0x34   : > { %587 = vmatpush1.bf16.msra.mxu0 %v889_v41 }
  0x35   : > { %588 = vmatprep.subr.bf16.mxu0 %v897_v42 }
  0x38   : > { %589 = vmatpush1.bf16.msra.mxu0 %v895_v43 }
  0x39   : > { %590 = vmatprep.subr.bf16.mxu0 %v903_v44 }
  0x3c   : > { %591 = vmatpush1.bf16.msra.mxu0 %v901_v45 }
  0x3d   : > { %592 = vmatprep.subr.bf16.mxu0 %v909_v46  ;;  %v684_v46 = vsel %vm1124_vm3, %v676_v32, 0.0 }
  0x40   : > { %593 = vmatpush1.bf16.msra.mxu0 %v907_v47 }
  0x41   : > { %594 = vmatprep.subr.bf16.mxu0 %v915_v48 }
  0x44   : > { %595 = vmatpush1.bf16.msra.mxu0 %v913_v49 }
  0x47   : > { %613 = vmatmul.mubr.bf16.vlgmr.msra.gmra.mrb[4].mxu0 %v870_v29  ;;  %v675_v29 = vcvt.s32.f32 %v673_v23 }
  0x49   : > { %v677_v40 = vmul.f32 0.01, %v675_v29 }
  0xfa   : > { %v315_v52 = vpop.f32.mrb[0].mxu0 }
  0xfb   : > { %v623_v53 = vrot.slane %v315_v52, 7  ;;  %v317_v54 = vpop.f32.mrb[1].mxu0 }
  0xfc   : > { %v319_v55 = vpop.f32.mrb[2].mxu0  ;;  %v624_v58 = vrot.slane %v317_v54, 7  ;;  %v470_v0 = vpop.f32.mrb[0].mxu1  ;;  %v686_v54 = vsel %vm1124_vm3, %v677_v40, 0.0 }
  0xfd   : > { %v625_v56 = vrot.slane %v319_v55, 7  ;;  %v321_v57 = vpop.f32.mrb[3].mxu0  ;;  %v644_v1 = vrot.slane %v470_v0, 1  ;;  %v472_v2 = vpop.f32.mrb[1].mxu1 }
  0xfe   : > { %v626_v59 = vrot.slane %v321_v57, 7  ;;  %v645_v3 = vrot.slane %v472_v2, 1  ;;  %v474_v4 = vpop.f32.mrb[2].mxu1 }
  0xff   : > { %v630_v60 = vsel %vm627_vm0, %v625_v56, %v623_v53  ;;  %v628_v61 = vsel %vm627_vm0, %v623_v53, %v625_v56  ;;  %v646_v5 = vrot.slane %v474_v4, 1  ;;  %v476_v6 = vpop.f32.mrb[3].mxu1 }
 0x100   : > { %v631_v62 = vsel %vm627_vm0, %v626_v59, %v624_v58  ;;  %v629_v63 = vsel %vm627_vm0, %v624_v58, %v626_v59  ;;  %v647_v8 = vrot.slane %v476_v6, 1  ;;  %v636_v36 = vsel %vm1120_vm2, %v630_v60, 0.0 }
 0x101   : > { %v649_v9 = vsel %vm648_vm1, %v644_v1, %v646_v5  ;;  %v651_v10 = vsel %vm648_vm1, %v646_v5, %v644_v1  ;;  %v637_v43 = vsel %vm1120_vm2, %v631_v62, 0.0  ;;  %v687_v59 = vsel %vm1130_vm4, %v677_v40, 0.0 }
 0x102   : > { %v650_v11 = vsel %vm648_vm1, %v645_v3, %v647_v8  ;;  %v652_v12 = vsel %vm648_vm1, %v647_v8, %v645_v3  ;;  %v659_v53 = vsel %vm1134_vm5, %v651_v10, 0.0 }
 0x103   : > { %v660_v56 = vsel %vm1134_vm5, %v652_v12, 0.0 }
 0x11a   : > { %v614_v31 = vpop.f32.mrb[4].mxu0 }
 0x11b   : > { %v615_v33 = vadd.f32 %v614_v31, %v493_v25  ;;  %v616_v35 = vpop.f32.mrb[5].mxu0 }
 0x11c   : > { %v617_v37 = vadd.f32 %v616_v35, %v497_v27  ;;  %v618_v39 = vpop.f32.mrb[6].mxu0 }
 0x11d   : > { %v640_v42 = vadd.f32 %v636_v36, %v615_v33  ;;  %v619_v44 = vadd.f32 %v618_v39, %v493_v25  ;;  %v620_v45 = vpop.f32.mrb[7].mxu0 }
 0x11e   : > { %v641_v47 = vadd.f32 %v637_v43, %v617_v37  ;;  %v621_v48 = vadd.f32 %v620_v45, %v497_v27 }
 0x11f   : > { %v661_v49 = vadd.f32 %v649_v9, %v640_v42  ;;  %v642_v51 = vadd.f32 %v628_v61, %v619_v44 }
 0x120   : > { %v662_v52 = vadd.f32 %v650_v11, %v641_v47  ;;  %v643_v55 = vadd.f32 %v629_v63, %v621_v48 }
 0x121   : > { %v688_v57 = vadd.f32 %v684_v46, %v661_v49  ;;  %v663_v58 = vadd.f32 %v659_v53, %v642_v51 }
 0x122   : > { %v689_v60 = vadd.f32 %v685_v50, %v662_v52  ;;  %v664_v62 = vadd.f32 %v660_v56, %v643_v55 }
 0x123   : > { %v694_v61 = vmul.f32 1.442695, %v688_v57  ;;  %v690_v0 = vadd.f32 %v686_v54, %v663_v58 }
 0x124   : > { %v696_v1 = vmul.f32 1.442695, %v689_v60  ;;  %v691_v2 = vadd.f32 %v687_v59, %v664_v62 }
 0x125   : > { %916 = vpow2.f32 %v694_v61  ;;  %v698_v3 = vmul.f32 1.442695, %v690_v0 }
 0x126   : > { %918 = vpow2.f32 %v696_v1  ;;  %v700_v4 = vmul.f32 1.442695, %v691_v2 }
 0x127   : > { %920 = vpow2.f32 %v698_v3 }
 0x128   : > { %922 = vpow2.f32 %v700_v4 }
 0x12f   : > { %v917_v63 = vpop.eup %916 }
 0x130   : > { %v919_v5 = vpop.eup %918  ;;  %v706_v6 = vsel %vm692_vm6, %v917_v63, %v688_v57 }
 0x131   : > { %v921_v7 = vpop.eup %920  ;;  %710 = vst [vmem:[%s174_s21] sm:$0xff] %v706_v6  ;;  %v707_v8 = vsel %vm693_vm7, %v919_v5, %v689_v60 }
 0x132   : > { %v923_v9 = vpop.eup %922  ;;  %711 = vst [vmem:[%s174_s21 + $0x8] sm:$0xff] %v707_v8  ;;  %v708_v10 = vsel %vm692_vm6, %v921_v7, %v690_v0 }
 0x133   : > { %712 = vst [vmem:[%s174_s21 + $0x10] sm:$0xff] %v708_v10  ;;  %v709_v11 = vsel %vm693_vm7, %v923_v9, %v691_v2 }
 0x134   : > { %713 = vst [vmem:[%s174_s21 + $0x18] sm:$0xff] %v709_v11 }
 0x135 PF: > { %s13_s12 = sadd.s32 1, %s930_s12  }
 0x136   : > { %p10_p4 = scmp.ge.s32.totalorder %s13_s12, 4  }
 0x138   :  { %12 = sbr.rel (!%p10_p4) target bundleno = 1 (0x1), region = 62 }

// kernel: run_heads.3
= control target key start
LH: loop header
LB: loop body
LE: loop exit
PB: predicated region body
PF: predicated region fallthrough
CT: control target
= control target key end

     0   :  { %s805_s12 = smov 0   ;;  %s942_s0 = inlined_call_operand.vmem [shape: bf16[32,128], index: 0, kind: input, shape index: {}]   ;;  %s943_s1 = inlined_call_operand.vmem [shape: bf16[384,128], index: 1, kind: input, shape index: {}]   ;;  %s944_s2 = inlined_call_operand.vmem [shape: f32[1,128], index: 2, kind: input, shape index: {}]   ;;  %s945_s3 = inlined_call_operand.vmem [shape: f32[32,128], index: 3, kind: output, shape index: {}]  }
   0x1 LB: > { %s616_s13 = sadd.s32 4294967295, %s781_s12   ;;  %p620_p0 = scmp.ge.s32.totalorder %s781_s12, 1  ;;  %s781_s12 = sphi %s805_s12, %s13_s12  }
   0x2   : > { %p138_p1 = scmp.lt.s32.totalorder %s781_s12, 3 }
   0x4   : > { %p139_p2 = pnand %p620_p0, %p138_p1 }
   0x5   : > { %v750_v0 = vld [vmem:[%s943_s1] sm:$0xff] (!%p139_p2)   ;;  %v783_v1 = vmov (!%p139_p2), 0.0   ;;  %v751_v2 = vld [vmem:[%s943_s1 + $0x8] sm:$0xff] (!%p139_p2)   ;;  %vm784_vm0 = vmmov (!%p139_p2), 0   ;;  %s621_s18 = sshll.u32 (!%p139_p2), %s616_s13, 1  ;;  %v752_v3 = vld [vmem:[%s943_s1 + $0x10] sm:$0xff] (!%p139_p2)   ;;  %v409_v26 = vlaneseq (!%p139_p2) }
   0x6   : > { %142 = sbr.rel (%p139_p2) target bundleno = 293 (0x125), region = 32  ;;  %680 = vmatprep.subr.bf16.mxu0 (!%p139_p2), %v783_v1  ;;  %700 = vmatprep.subr.bf16.mxu1 (!%p139_p2), %v783_v1  ;;  %p163_p3 = scmp.lt.s32.totalorder (!%p139_p2), %s621_s18, 3  ;;  %v758_v4 = vld [vmem:[%s943_s1 + $0x80] sm:$0xff] (!%p139_p2)   ;;  %v753_v5 = vld [vmem:[%s943_s1 + $0x18] sm:$0xff] (!%p139_p2)   ;;  %v761_v6 = vld [vmem:[%s943_s1 + $0x88] sm:$0xff] (!%p139_p2)  }
   0x7   : > { %681 = vmatpush3.bf16.msra.mxu0 (!%p139_p2), %v750_v0  ;;  %696 = vmatprep.mubr.msk.bf16.mxu0 (!%p139_p2), %vm784_vm0, %v783_v1  ;;  %v754_v7 = vld [vmem:[%s943_s1 + $0x20] sm:$0xff] (!%p139_p2)   ;;  %v763_v8 = vld [vmem:[%s943_s1 + $0x90] sm:$0xff] (!%p139_p2)   ;;  %v755_v9 = vld [vmem:[%s943_s1 + $0x28] sm:$0xff] (!%p139_p2)   ;;  %v410_v27 = vshrl.u32 (!%p139_p2), %v409_v26, 7  ;;  %v541_v50 = vand.u32 (!%p139_p2), 127, %v409_v26 }
   0x8   : > { %682 = vmatprep.subr.bf16.mxu0 (!%p139_p2), %v783_v1  ;;  %716 = vmatprep.mubr.msk.bf16.mxu1 (!%p139_p2), %vm784_vm0, %v783_v1  ;;  %v765_v10 = vld [vmem:[%s943_s1 + $0x98] sm:$0xff] (!%p139_p2)   ;;  %v756_v11 = vld [vmem:[%s943_s1 + $0x30] sm:$0xff] (!%p139_p2)   ;;  %v767_v12 = vld [vmem:[%s943_s1 + $0xa0] sm:$0xff] (!%p139_p2)  }
   0x9   : > { %701 = vmatpush3.bf16.msra.mxu1 (!%p139_p2), %v758_v4  ;;  %v757_v13 = vld [vmem:[%s943_s1 + $0x38] sm:$0xff] (!%p139_p2)   ;;  %v769_v14 = vld [vmem:[%s943_s1 + $0xa8] sm:$0xff] (!%p139_p2)   ;;  %v760_v16 = vld [vmem:[%s943_s1 + $0x40] sm:$0xff] (!%p139_p2)   ;;  %vm516_vm1 = vcmp.lt.s32.totalorder (!%p139_p2), %v410_v27, 1  ;;  %vm529_vm2 = vcmp.lt.s32.totalorder (!%p139_p2), %v410_v27, 7  ;;  %v411_v44 = vadd.s32 (!%p139_p2), 8, %v410_v27 }
   0xa   : > { %702 = vmatprep.subr.bf16.mxu1 (!%p139_p2), %v783_v1  ;;  %v771_v17 = vld [vmem:[%s943_s1 + $0xb0] sm:$0xff] (!%p139_p2)   ;;  %v762_v18 = vld [vmem:[%s943_s1 + $0x48] sm:$0xff] (!%p139_p2)   ;;  %v773_v19 = vld [vmem:[%s943_s1 + $0xb8] sm:$0xff] (!%p139_p2)   ;;  %v412_v45 = vand.u32 (!%p139_p2), 15, %v410_v27  ;;  %v542_v53 = vand.u32 (!%p139_p2), 7, %v541_v50 }
   0xb   : > { %683 = vmatpush3.bf16.msra.mxu0 (!%p139_p2), %v751_v2  ;;  %v764_v20 = vld [vmem:[%s943_s1 + $0x50] sm:$0xff] (!%p139_p2)   ;;  %v766_v21 = vld [vmem:[%s943_s1 + $0x58] sm:$0xff] (!%p139_p2)   ;;  %v768_v22 = vld [vmem:[%s943_s1 + $0x60] sm:$0xff] (!%p139_p2)   ;;  %v413_v46 = vand.u32 (!%p139_p2), 15, %v411_v44 }
   0xc   : > { %684 = vmatprep.subr.bf16.mxu0 (!%p139_p2), %v783_v1  ;;  %v770_v23 = vld [vmem:[%s943_s1 + $0x68] sm:$0xff] (!%p139_p2)   ;;  %v772_v24 = vld [vmem:[%s943_s1 + $0x70] sm:$0xff] (!%p139_p2)   ;;  %v774_v25 = vld [vmem:[%s943_s1 + $0x78] sm:$0xff] (!%p139_p2)   ;;  %v543_v47 = vmul.u32 (!%p139_p2), 4, %v412_v45  ;;  %vm414_vm3 = vcmp.ne.s32.totalorder (!%p139_p2), %v412_v45, 0  ;;  %vm927_vm4 = vcmp.eq.s32.totalorder (!%p139_p2), %v542_v53, 1 }
   0xd   : > { %s949_s18 = smov (!%p163_p3, %s621_s18), 3  ;;  %703 = vmatpush3.bf16.msra.mxu1 %v761_v6  ;;  %v544_v48 = vmul.u32 4, %v413_v46  ;;  %v642_v54 = vld [vmem:[%s944_s2] ss:$0 sm:$0xff]  ;;  %vm417_vm5 = vcmp.ne.s32.totalorder %v413_v46, 15 }
   0xe   : > { %s622_s21 = sshll.u32 %s949_s18, 2  ;;  %704 = vmatprep.subr.bf16.mxu1 %v783_v1  ;;  %v545_v49 = vadd.s32 2, %v543_v47  ;;  %s624_s19 = sshll.u32 %s949_s18, 3 }
   0xf   : > { %s839_s26 = scalar_lea.vmem %s942_s0, %s622_s21  ;;  %685 = vmatpush3.bf16.msra.mxu0 %v752_v3  ;;  %v546_v51 = vadd.s32 2, %v544_v48  ;;  %s172_s22 = scalar_lea.vmem %s945_s3, %s624_s19 }
  0x10   : > { %686 = vmatprep.subr.bf16.mxu0 %v783_v1  ;;  %v759_v15 = vld [vmem:[%s839_s26] sm:$0xff]   ;;  %v547_v52 = vcvt.s32.f32 %v545_v49 }
  0x11   : > { %705 = vmatpush3.bf16.msra.mxu1 %v763_v8  ;;  %v548_v55 = vcvt.s32.f32 %v546_v51 }
  0x12   : > { %706 = vmatprep.subr.bf16.mxu1 %v783_v1  ;;  %v549_v57 = vmul.f32 0.01, %v547_v52 }
  0x13   : > { %687 = vmatpush3.bf16.msra.mxu0 %v753_v5  ;;  %v550_v63 = vmul.f32 0.01, %v548_v55 }
  0x14   : > { %688 = vmatprep.subr.bf16.mxu0 %v783_v1  ;;  %v554_v3 = vsel %vm927_vm4, %v549_v57, 0.0 }
  0x15   : > { %707 = vmatpush3.bf16.msra.mxu1 %v765_v10 }
  0x16   : > { %708 = vmatprep.subr.bf16.mxu1 %v783_v1 }
  0x17   : > { %689 = vmatpush3.bf16.msra.mxu0 %v754_v7  ;;  %v555_v7 = vsel %vm927_vm4, %v550_v63, 0.0 }
  0x18   : > { %690 = vmatprep.subr.bf16.mxu0 %v783_v1 }
  0x19   : > { %709 = vmatpush3.bf16.msra.mxu1 %v767_v12 }
  0x1a   : > { %710 = vmatprep.subr.bf16.mxu1 %v783_v1 }
  0x1b   : > { %691 = vmatpush3.bf16.msra.mxu0 %v755_v9 }
  0x1c   : > { %692 = vmatprep.subr.bf16.mxu0 %v783_v1 }
  0x1d   : > { %711 = vmatpush3.bf16.msra.mxu1 %v769_v14 }
  0x1e   : > { %712 = vmatprep.subr.bf16.mxu1 %v783_v1 }
  0x1f   : > { %693 = vmatpush3.bf16.msra.mxu0 %v756_v11 }
  0x20   : > { %694 = vmatprep.subr.bf16.mxu0 %v783_v1 }
  0x21   : > { %713 = vmatpush3.bf16.msra.mxu1 %v771_v17 }
  0x22   : > { %714 = vmatprep.subr.bf16.mxu1 %v783_v1 }
  0x23   : > { %695 = vmatpush3.bf16.msra.mxu0 %v757_v13 }
  0x24   : > { %720 = vmatprep.subr.bf16.mxu0 %v783_v1 }
  0x25   : > { %715 = vmatpush3.bf16.msra.mxu1 %v773_v19 }
  0x26   : > { %697 = vmatmul.mubr.bf16.vlgmr.msra.gmra.mrb[0].mxu0 %v759_v15 }
  0x27   : > { %721 = vmatpush3.bf16.msra.mxu0 %v760_v16  ;;  %736 = vmatprep.mubr.msk.bf16.mxu0 %vm784_vm0, %v783_v1 }
  0x28   : > { %722 = vmatprep.subr.bf16.mxu0 %v783_v1  ;;  %717 = vmatmul.mubr.bf16.vlgmr.msra.gmra.mrb[0].mxu1 %v759_v15 }
  0x2b   : > { %723 = vmatpush3.bf16.msra.mxu0 %v762_v18 }
  0x2c   : > { %724 = vmatprep.subr.bf16.mxu0 %v783_v1 }
  0x2f   : > { %725 = vmatpush3.bf16.msra.mxu0 %v764_v20 }
  0x30   : > { %726 = vmatprep.subr.bf16.mxu0 %v783_v1 }
  0x33   : > { %727 = vmatpush3.bf16.msra.mxu0 %v766_v21 }
  0x34   : > { %728 = vmatprep.subr.bf16.mxu0 %v783_v1 }
  0x37   : > { %729 = vmatpush3.bf16.msra.mxu0 %v768_v22 }
  0x38   : > { %730 = vmatprep.subr.bf16.mxu0 %v783_v1 }
  0x3b   : > { %731 = vmatpush3.bf16.msra.mxu0 %v770_v23 }
  0x3c   : > { %732 = vmatprep.subr.bf16.mxu0 %v783_v1 }
  0x3f   : > { %733 = vmatpush3.bf16.msra.mxu0 %v772_v24 }
  0x40   : > { %734 = vmatprep.subr.bf16.mxu0 %v783_v1 }
  0x43   : > { %735 = vmatpush3.bf16.msra.mxu0 %v774_v25 }
  0x46   : > { %737 = vmatmul.mubr.bf16.vlgmr.msra.gmra.mrb[4].mxu0 %v759_v15 }
  0xf9   : > { %v281_v28 = vpop.f32.mrb[0].mxu0 }
  0xfa   : > { %v514_v29 = vrot.slane %v281_v28, 7  ;;  %v698_v30 = vpop.f32.mrb[1].mxu0 }
  0xfb   : > { %v284_v31 = vpop.f32.mrb[2].mxu0  ;;  %v402_v36 = vpop.f32.mrb[0].mxu1 }
  0xfc   : > { %v515_v32 = vrot.slane %v284_v31, 7  ;;  %v699_v33 = vpop.f32.mrb[3].mxu0  ;;  %v527_v37 = vrot.slane %v402_v36, 1  ;;  %v718_v38 = vpop.f32.mrb[1].mxu1 }
  0xfd   : > { %v405_v39 = vpop.f32.mrb[2].mxu1 }
  0xfe   : > { %v518_v34 = vsel %vm516_vm1, %v515_v32, %v514_v29  ;;  %v517_v35 = vsel %vm516_vm1, %v514_v29, %v515_v32  ;;  %v528_v40 = vrot.slane %v405_v39, 1  ;;  %v719_v41 = vpop.f32.mrb[3].mxu1 }
  0xff   : > { %v523_v61 = vsel %vm414_vm3, %v518_v34, 0.0 }
 0x100   : > { %v530_v42 = vsel %vm529_vm2, %v527_v37, %v528_v40  ;;  %v531_v43 = vsel %vm529_vm2, %v528_v40, %v527_v37 }
 0x101   : > { %v537_v6 = vsel %vm417_vm5, %v531_v43, 0.0 }
 0x119   : > { %v507_v56 = vpop.f32.mrb[4].mxu0 }
 0x11a   : > { %v508_v58 = vadd.f32 %v642_v54, %v507_v56  ;;  %v738_v60 = vpop.f32.mrb[5].mxu0 }
 0x11b   : > { %v510_v62 = vpop.f32.mrb[6].mxu0 }
 0x11c   : > { %v525_v0 = vadd.f32 %v523_v61, %v508_v58  ;;  %v511_v1 = vadd.f32 %v642_v54, %v510_v62  ;;  %v739_v2 = vpop.f32.mrb[7].mxu0 }
 0x11e   : > { %v538_v4 = vadd.f32 %v530_v42, %v525_v0  ;;  %v526_v5 = vadd.f32 %v517_v35, %v511_v1 }
 0x120   : > { %v556_v8 = vadd.f32 %v554_v3, %v538_v4  ;;  %v539_v9 = vadd.f32 %v537_v6, %v526_v5 }
 0x122   : > { %558 = vst [vmem:[%s172_s22] sm:$0xff] %v556_v8  ;;  %v557_v10 = vadd.f32 %v555_v7, %v539_v9 }
 0x124   : > { %559 = vst [vmem:[%s172_s22 + $0x8] sm:$0xff] %v557_v10 }
 0x125 PF: > { %s13_s12 = sadd.s32 1, %s781_s12  }
 0x126   : > { %p10_p4 = scmp.ge.s32.totalorder %s13_s12, 4  }
 0x128   :  { %12 = sbr.rel (!%p10_p4) target bundleno = 1 (0x1), region = 62 }

</bundles_post_ra>
